<compile_context>
chip_gen: v7x
topology: tpu7x:2x2x1
jax: 0.10.0
libtpu: 0.0.40
codegen_flags: <defaults>
</compile_context>

<pallas_src>
import jax
import jax.numpy as jnp
from jax.experimental import pallas as pl
from jax.experimental.pallas import tpu as pltpu


def _round_up(x, m):
    return ((x + m - 1) // m) * m


def _elu(x):
    # F.elu with alpha=1.0:  x if x > 0 else exp(x) - 1  (exp goes to the EUP).
    # No jnp.minimum guard: the where discards the positive branch (forward-safe).
    return jnp.where(x > 0, x, jnp.exp(x) - 1.0)


def _edgenet_mlp_kernel(inp_ref, w0_ref, b0_ref, w1_ref, b1_ref,
                        w2_ref, b2_ref, out_ref):
    """Fused Linear->ELU->Linear->ELU->Linear on one (block_e, in_ch) edge tile.

    Weights are pre-transposed to (in_features, out_features) bf16; matmuls
    accumulate in f32 on the MXU; bias add + ELU run in f32 on the VPU/EUP.
    """
    h = jnp.dot(inp_ref[...], w0_ref[...],
                preferred_element_type=jnp.float32) + b0_ref[...]
    h = _elu(h)
    h = jnp.dot(h.astype(jnp.bfloat16), w1_ref[...],
                preferred_element_type=jnp.float32) + b1_ref[...]
    h = _elu(h)
    h = jnp.dot(h.astype(jnp.bfloat16), w2_ref[...],
                preferred_element_type=jnp.float32) + b2_ref[...]
    out_ref[...] = h.astype(out_ref.dtype)


def prepare_params(weights, biases):
    """One-time padding/casting of the MLP parameters (hoisted out of forward).

    weights[k] has shape (in_k, out_k) (already transposed vs. PyTorch).
    Hidden dim is zero-padded to a multiple of 128 lanes; output dim is NOT
    padded.  Weights are cast to bf16 (MXU operands), biases stay f32.
    """
    in_ch, hid = weights[0].shape
    out_ch = weights[2].shape[1]
    hpad = _round_up(hid, 128)

    w0 = jnp.pad(weights[0], ((0, 0), (0, hpad - hid))).astype(jnp.bfloat16)
    b0 = jnp.pad(biases[0], (0, hpad - hid)).reshape(1, hpad).astype(jnp.float32)
    w1 = jnp.pad(weights[1], ((0, hpad - hid), (0, hpad - hid))).astype(jnp.bfloat16)
    b1 = jnp.pad(biases[1], (0, hpad - hid)).reshape(1, hpad).astype(jnp.float32)
    w2 = jnp.pad(weights[2], ((0, hpad - hid), (0, 0))).astype(jnp.bfloat16)
    b2 = biases[2].reshape(1, out_ch).astype(jnp.float32)
    return (w0, b0, w1, b1, w2, b2), (in_ch, hpad, out_ch)


def edgenet_forward(x, edge_index, pos, prepared, dims, *, block_e=2048):
    """EdgeNet forward.  x: (N, F), edge_index: (2, E) int32, pos: (N, dim).

    `prepared`, `dims` come from prepare_params.  Returns (E, out_ch) float32.
    """
    w0, b0, w1, b1, w2, b2 = prepared
    in_ch, hpad, out_ch = dims

    # --- edge feature construction (graph gather + concat), pure XLA ---
    # TODO(synk): for small node tables this gather could be fused into the
    # kernel (PrefetchScalarGridSpec on edge_index + VMEM-resident x/pos);
    # kept in XLA since the per-edge row gather has no clean BlockSpec form.
    src = edge_index[0]
    dst = edge_index[1]
    edge_attr = pos[dst] - pos[src]
    inputs = jnp.concatenate([edge_attr, x[src], x[dst]],
                             axis=1).astype(jnp.bfloat16)

    e = inputs.shape[0]
    assert inputs.shape[1] == in_ch
    if e == 0:
        return jnp.zeros((0, out_ch), jnp.float32)

    # Tile size: big tiles to amortize per-step overhead, but >= 2 grid steps
    # for moderate/large E (both v7x TensorCores get work); multiple of 16
    # sublanes for bf16 packing.
    block_e = max(16, min(block_e, _round_up(pl.cdiv(e, 2), 16)))
    e_pad = _round_up(e, block_e)
    if e_pad != e:
        inputs = jnp.pad(inputs, ((0, e_pad - e), (0, 0)))

    grid = (e_pad // block_e,)

    out = pl.pallas_call(
        _edgenet_mlp_kernel,
        grid=grid,
        in_specs=[
            pl.BlockSpec((block_e, in_ch), lambda i: (i, 0)),   # edge-tile inputs
            pl.BlockSpec((in_ch, hpad), lambda i: (0, 0)),      # W0 (VMEM-resident)
            pl.BlockSpec((1, hpad), lambda i: (0, 0)),          # b0
            pl.BlockSpec((hpad, hpad), lambda i: (0, 0)),       # W1
            pl.BlockSpec((1, hpad), lambda i: (0, 0)),          # b1
            pl.BlockSpec((hpad, out_ch), lambda i: (0, 0)),     # W2 (compact out dim)
            pl.BlockSpec((1, out_ch), lambda i: (0, 0)),        # b2
        ],
        out_specs=pl.BlockSpec((block_e, out_ch), lambda i: (i, 0)),
        out_shape=jax.ShapeDtypeStruct((e_pad, out_ch), jnp.float32),
        compiler_params=pltpu.CompilerParams(
            dimension_semantics=("parallel",)),
    )(inputs, w0, b0, w1, b1, w2, b2)

    # Only strip row padding (no lane padding to strip -- output is compact).
    return out[:e] if e_pad != e else out


def init_params(key, in_ch, hid, out_ch):
    """Weights stored pre-transposed as (in, out); PyTorch-Linear-style U(+-1/sqrt(fan_in))."""
    dims = [(in_ch, hid), (hid, hid), (hid, out_ch)]
    weights, biases = [], []
    for fi, fo in dims:
        key, kw, kb = jax.random.split(key, 3)
        bound = 1.0 / (float(fi) ** 0.5)
        weights.append(jax.random.uniform(kw, (fi, fo), jnp.float32, -bound, bound))
        biases.append(jax.random.uniform(kb, (fo,), jnp.float32, -bound, bound))
    return weights, biases


def reference_forward(x, edge_index, pos, weights, biases):
    """Pure-JAX f32 reference matching the PyTorch EdgeNet.forward exactly."""
    edge_attr = pos[edge_index[1]] - pos[edge_index[0]]
    inputs = jnp.concatenate([edge_attr, x[edge_index[0]], x[edge_index[1]]],
                             axis=1)
    h = _elu(inputs @ weights[0] + biases[0])
    h = _elu(h @ weights[1] + biases[1])
    return h @ weights[2] + biases[2]


if __name__ == "__main__":
    dim, feat, hidden, out_ch = 3, 4, 32, 8
    num_nodes, num_edges = 16, 32
    in_ch = dim + 2 * feat  # edge_attr ++ node_i ++ node_j

    key = jax.random.PRNGKey(0)
    kp, kx, kpos, ke = jax.random.split(key, 4)
    weights, biases = init_params(kp, in_ch, hidden, out_ch)
    prepared, dims = prepare_params(weights, biases)   # hoisted, one-time

    x = jax.random.normal(kx, (num_nodes, feat), jnp.float32)
    pos = jax.random.normal(kpos, (num_nodes, dim), jnp.float32)
    edge_index = jax.random.randint(ke, (2, num_edges), 0, num_nodes, jnp.int32)

    out = edgenet_forward(x, edge_index, pos, prepared, dims)
    out = jax.block_until_ready(out)

    ref = reference_forward(x, edge_index, pos, weights, biases)
    assert out.shape == (num_edges, out_ch)
    max_err = float(jnp.max(jnp.abs(out - ref)))
    # bf16 matmul operands vs f32 reference -> loosened tolerance.
    assert jnp.allclose(out, ref, atol=5e-2, rtol=5e-2), f"max_err={max_err}"

    print("KERNEL_OK")
</pallas_src>

<mosaic_0001>
module attributes {stable_mosaic.version = 11 : i64} {
  func.func @_edgenet_mlp_kernel(%arg0: i32, %arg1: memref<16x11xbf16, #tpu.memory_space<vmem>>, %arg2: memref<11x128xbf16, #tpu.memory_space<vmem>>, %arg3: memref<1x128xf32, #tpu.memory_space<vmem>>, %arg4: memref<128x128xbf16, #tpu.memory_space<vmem>>, %arg5: memref<1x128xf32, #tpu.memory_space<vmem>>, %arg6: memref<128x8xbf16, #tpu.memory_space<vmem>>, %arg7: memref<1x8xf32, #tpu.memory_space<vmem>>, %arg8: memref<16x8xf32, #tpu.memory_space<vmem>>) attributes {dimension_semantics = [#tpu.dimension_semantics<parallel>], iteration_bounds = array<i64: 2>, scalar_prefetch = 0 : i64, scratch_operands = 0 : i64, tpu.core_type = #tpu.core_type<tc>, window_params = [{transform_indices = @transform_0, window_bounds = array<i64: 16, 11>}, {pipeline_mode = #tpu.pipeline_mode<synchronous>, transform_indices = @transform_1, window_bounds = array<i64: 11, 128>}, {pipeline_mode = #tpu.pipeline_mode<synchronous>, transform_indices = @transform_2, window_bounds = array<i64: 1, 128>}, {pipeline_mode = #tpu.pipeline_mode<synchronous>, transform_indices = @transform_3, window_bounds = array<i64: 128, 128>}, {pipeline_mode = #tpu.pipeline_mode<synchronous>, transform_indices = @transform_4, window_bounds = array<i64: 1, 128>}, {pipeline_mode = #tpu.pipeline_mode<synchronous>, transform_indices = @transform_5, window_bounds = array<i64: 128, 8>}, {pipeline_mode = #tpu.pipeline_mode<synchronous>, transform_indices = @transform_6, window_bounds = array<i64: 1, 8>}, {transform_indices = @transform_7, window_bounds = array<i64: 16, 8>}]} {
    %c0 = arith.constant 0 : index
    %c0_0 = arith.constant 0 : index
    %0 = vector.load %arg1[%c0, %c0_0] : memref<16x11xbf16, #tpu.memory_space<vmem>>, vector<16x11xbf16>
    %c0_1 = arith.constant 0 : index
    %c0_2 = arith.constant 0 : index
    %1 = vector.load %arg2[%c0_1, %c0_2] : memref<11x128xbf16, #tpu.memory_space<vmem>>, vector<11x128xbf16>
    %cst = arith.constant dense<0.000000e+00> : vector<16x128xf32>
    %2 = tpu.matmul %0, %1, %cst {dimension_numbers = #tpu.dot_dimension_numbers<[1], [0], [0], [1], [0, 0, 1, 1], [], []>} : vector<16x11xbf16>, vector<11x128xbf16>, vector<16x128xf32> -> vector<16x128xf32>
    %c0_3 = arith.constant 0 : index
    %c0_4 = arith.constant 0 : index
    %3 = vector.load %arg3[%c0_3, %c0_4] : memref<1x128xf32, #tpu.memory_space<vmem>>, vector<1x128xf32>
    %4 = vector.broadcast %3 : vector<1x128xf32> to vector<16x128xf32>
    %5 = arith.addf %2, %4 : vector<16x128xf32>
    %cst_5 = arith.constant 0.000000e+00 : f32
    %6 = vector.broadcast %cst_5 : f32 to vector<16x128xf32>
    %7 = arith.cmpf ogt, %5, %6 : vector<16x128xf32>
    %8 = math.exp %5 : vector<16x128xf32>
    %cst_6 = arith.constant 1.000000e+00 : f32
    %9 = vector.broadcast %cst_6 : f32 to vector<16x128xf32>
    %10 = arith.subf %8, %9 : vector<16x128xf32>
    %11 = arith.select %7, %5, %10 : vector<16x128xi1>, vector<16x128xf32>
    %12 = arith.truncf %11 : vector<16x128xf32> to vector<16x128xbf16>
    %c0_7 = arith.constant 0 : index
    %c0_8 = arith.constant 0 : index
    %13 = vector.load %arg4[%c0_7, %c0_8] : memref<128x128xbf16, #tpu.memory_space<vmem>>, vector<128x128xbf16>
    %cst_9 = arith.constant dense<0.000000e+00> : vector<16x128xf32>
    %14 = tpu.matmul %12, %13, %cst_9 {dimension_numbers = #tpu.dot_dimension_numbers<[1], [0], [0], [1], [0, 0, 1, 1], [], []>} : vector<16x128xbf16>, vector<128x128xbf16>, vector<16x128xf32> -> vector<16x128xf32>
    %c0_10 = arith.constant 0 : index
    %c0_11 = arith.constant 0 : index
    %15 = vector.load %arg5[%c0_10, %c0_11] : memref<1x128xf32, #tpu.memory_space<vmem>>, vector<1x128xf32>
    %16 = vector.broadcast %15 : vector<1x128xf32> to vector<16x128xf32>
    %17 = arith.addf %14, %16 : vector<16x128xf32>
    %cst_12 = arith.constant 0.000000e+00 : f32
    %18 = vector.broadcast %cst_12 : f32 to vector<16x128xf32>
    %19 = arith.cmpf ogt, %17, %18 : vector<16x128xf32>
    %20 = math.exp %17 : vector<16x128xf32>
    %cst_13 = arith.constant 1.000000e+00 : f32
    %21 = vector.broadcast %cst_13 : f32 to vector<16x128xf32>
    %22 = arith.subf %20, %21 : vector<16x128xf32>
    %23 = arith.select %19, %17, %22 : vector<16x128xi1>, vector<16x128xf32>
    %24 = arith.truncf %23 : vector<16x128xf32> to vector<16x128xbf16>
    %c0_14 = arith.constant 0 : index
    %c0_15 = arith.constant 0 : index
    %25 = vector.load %arg6[%c0_14, %c0_15] : memref<128x8xbf16, #tpu.memory_space<vmem>>, vector<128x8xbf16>
    %cst_16 = arith.constant dense<0.000000e+00> : vector<16x8xf32>
    %26 = tpu.matmul %24, %25, %cst_16 {dimension_numbers = #tpu.dot_dimension_numbers<[1], [0], [0], [1], [0, 0, 1, 1], [], []>} : vector<16x128xbf16>, vector<128x8xbf16>, vector<16x8xf32> -> vector<16x8xf32>
    %c0_17 = arith.constant 0 : index
    %c0_18 = arith.constant 0 : index
    %27 = vector.load %arg7[%c0_17, %c0_18] : memref<1x8xf32, #tpu.memory_space<vmem>>, vector<1x8xf32>
    %28 = vector.broadcast %27 : vector<1x8xf32> to vector<16x8xf32>
    %29 = arith.addf %26, %28 : vector<16x8xf32>
    %c0_19 = arith.constant 0 : index
    %c0_20 = arith.constant 0 : index
    %30 = vector.load %arg8[%c0_19, %c0_20] : memref<16x8xf32, #tpu.memory_space<vmem>>, vector<16x8xf32>
    tpu.vector_store %arg8[%c0_19, %c0_20], %29 {strides = array<i32>} : memref<16x8xf32, #tpu.memory_space<vmem>>, vector<16x8xf32>,
    return
  }
  func.func @transform_0(%arg0: i32) -> (i32, i32) {
    %c0_i32 = arith.constant 0 : i32
    %c0_i32_0 = arith.constant 0 : i32
    return %arg0, %c0_i32 : i32, i32
  }
  func.func @transform_1(%arg0: i32) -> (i32, i32) {
    %c0_i32 = arith.constant 0 : i32
    %c0_i32_0 = arith.constant 0 : i32
    %c0_i32_1 = arith.constant 0 : i32
    return %c0_i32, %c0_i32_0 : i32, i32
  }
  func.func @transform_2(%arg0: i32) -> (i32, i32) {
    %c0_i32 = arith.constant 0 : i32
    %c0_i32_0 = arith.constant 0 : i32
    %c0_i32_1 = arith.constant 0 : i32
    return %c0_i32, %c0_i32_0 : i32, i32
  }
  func.func @transform_3(%arg0: i32) -> (i32, i32) {
    %c0_i32 = arith.constant 0 : i32
    %c0_i32_0 = arith.constant 0 : i32
    %c0_i32_1 = arith.constant 0 : i32
    return %c0_i32, %c0_i32_0 : i32, i32
  }
  func.func @transform_4(%arg0: i32) -> (i32, i32) {
    %c0_i32 = arith.constant 0 : i32
    %c0_i32_0 = arith.constant 0 : i32
    %c0_i32_1 = arith.constant 0 : i32
    return %c0_i32, %c0_i32_0 : i32, i32
  }
  func.func @transform_5(%arg0: i32) -> (i32, i32) {
    %c0_i32 = arith.constant 0 : i32
    %c0_i32_0 = arith.constant 0 : i32
    %c0_i32_1 = arith.constant 0 : i32
    return %c0_i32, %c0_i32_0 : i32, i32
  }
  func.func @transform_6(%arg0: i32) -> (i32, i32) {
    %c0_i32 = arith.constant 0 : i32
    %c0_i32_0 = arith.constant 0 : i32
    %c0_i32_1 = arith.constant 0 : i32
    return %c0_i32, %c0_i32_0 : i32, i32
  }
  func.func @transform_7(%arg0: i32) -> (i32, i32) {
    %c0_i32 = arith.constant 0 : i32
    %c0_i32_0 = arith.constant 0 : i32
    return %arg0, %c0_i32 : i32, i32
  }
}

</mosaic_0001>

<bundles_post_ra>
// kernel: tpu_custom_call.1
= control target key start
LH: loop header
LB: loop body
LE: loop exit
PB: predicated region body
PF: predicated region fallthrough
CT: control target
= control target key end

     0   :  { %s852_s24 = smov 0   ;;  %s956_s0 = inlined_call_operand.vmem [shape: bf16[32,11], index: 0, kind: input, shape index: {}]   ;;  %s957_s1 = inlined_call_operand.vmem [shape: bf16[11,128], index: 1, kind: input, shape index: {}]   ;;  %s958_s2 = inlined_call_operand.vmem [shape: f32[1,128], index: 2, kind: input, shape index: {}]   ;;  %s959_s3 = inlined_call_operand.vmem [shape: bf16[128,128], index: 3, kind: input, shape index: {}]   ;;  %s960_s4 = inlined_call_operand.vmem [shape: f32[1,128], index: 4, kind: input, shape index: {}]   ;;  %s961_s5 = inlined_call_operand.vmem [shape: bf16[128,8], index: 5, kind: input, shape index: {}]   ;;  %s962_s6 = inlined_call_operand.vmem [shape: f32[1,8], index: 6, kind: input, shape index: {}]   ;;  %s963_s7 = inlined_call_operand.vmem [shape: f32[32,8], index: 7, kind: output, shape index: {}]  }
   0x1 LB: > { %s661_s25 = sadd.s32 4294967295, %s807_s24   ;;  %p665_p0 = scmp.ge.s32.totalorder %s807_s24, 1  ;;  %s807_s24 = sphi %s852_s24, %s17_s24  }
   0x2   : > { %p238_p1 = scmp.lt.s32.totalorder %s807_s24, 3 }
   0x4   : > { %p239_p2 = pnand %p665_p0, %p238_p1 }
   0x5   : > { %vm308_vm0 = vcmask (!%p239_p2), 1044480   ;;  %v809_v0 = vmov (!%p239_p2), 0.0   ;;  %v775_v1 = vld [vmem:[%s957_s1] sm:$0x3f] (!%p239_p2)   ;;  %vm309_vm1 = vcmask (!%p239_p2), 1045504   ;;  %s666_s28 = sshll.u32 (!%p239_p2), %s661_s25, 1 }
   0x6   : > { %242 = sbr.rel (%p239_p2) target bundleno = 702 (0x2be), region = 48  ;;  %718 = vmatprep.subr.bf16.mxu0 (!%p239_p2), %v809_v0  ;;  %724 = vmatprep.subr.bf16.mxu1 (!%p239_p2), %v809_v0  ;;  %v810_v2 = vmov (!%p239_p2), 65535   ;;  %vm811_vm2 = vmmov (!%p239_p2), 0   ;;  %p271_p3 = scmp.lt.s32.totalorder (!%p239_p2), %s666_s28, 3  ;;  %v777_v4 = vld [vmem:[%s959_s3] sm:$0xff] (!%p239_p2)   ;;  %v778_v7 = vld [vmem:[%s959_s3 + $0x8] sm:$0xff] (!%p239_p2)  }
   0x7   : > { %v310_v3 = vsel (!%p239_p2), %vm308_vm0, 4294967295, %v810_v2  ;;  %720 = vmatprep.mubr.msk.bf16.mxu0 (!%p239_p2), %vm811_vm2, %v809_v0  ;;  %740 = vmatprep.mubr.msk.bf16.mxu1 (!%p239_p2), %vm811_vm2, %v809_v0  ;;  %vm304_vm3 = vcmask (!%p239_p2), 89088   ;;  %v779_v9 = vld [vmem:[%s959_s3 + $0x10] sm:$0xff] (!%p239_p2)   ;;  %v780_v10 = vld [vmem:[%s959_s3 + $0x18] sm:$0xff] (!%p239_p2)   ;;  %v781_v11 = vld [vmem:[%s959_s3 + $0x20] sm:$0xff] (!%p239_p2)   ;;  %vm602_vm8 = vcmask (!%p239_p2), 64512  }
   0x8   : > { %v311_v5 = vsel (!%p239_p2), %vm309_vm1, %v310_v3, 0  ;;  %725 = vmatpush3.bf16.msra.mxu1 (!%p239_p2), %v777_v4  ;;  %v782_v12 = vld [vmem:[%s959_s3 + $0x28] sm:$0xff] (!%p239_p2)   ;;  %v783_v13 = vld [vmem:[%s959_s3 + $0x30] sm:$0xff] (!%p239_p2)   ;;  %v784_v14 = vld [vmem:[%s959_s3 + $0x38] sm:$0xff] (!%p239_p2)  }
   0x9   : > { %v313_v6 = vand.u32 (!%p239_p2), %v775_v1, %v311_v5  ;;  %726 = vmatprep.subr.bf16.mxu1 (!%p239_p2), %v809_v0  ;;  %v785_v15 = vld [vmem:[%s961_s5] sm:$0xff] (!%p239_p2)   ;;  %v786_v16 = vld [vmem:[%s961_s5 + $0x8] sm:$0xff] (!%p239_p2)   ;;  %v787_v33 = vld [vmem:[%s961_s5 + $0x10] sm:$0xff] (!%p239_p2)  }
   0xa   : > { %v670_v17 = vld [vmem:[%s958_s2] ss:$0 sm:$0xff] (!%p239_p2)  ;;  %v788_v34 = vld [vmem:[%s961_s5 + $0x18] sm:$0xff] (!%p239_p2)   ;;  %v790_v36 = vld [vmem:[%s961_s5 + $0x28] sm:$0xff] (!%p239_p2)  }
   0xb   : > { %719 = vmatpush3.bf16.msra.mxu0 (!%p239_p2), %v313_v6  ;;  %v789_v35 = vld [vmem:[%s961_s5 + $0x20] sm:$0xff] (!%p239_p2)   ;;  %v791_v37 = vld [vmem:[%s961_s5 + $0x30] sm:$0xff] (!%p239_p2)   ;;  %v792_v38 = vld [vmem:[%s961_s5 + $0x38] sm:$0xff] (!%p239_p2)  }
   0xc   : > { %744 = vmatprep.subr.bf16.mxu0 (!%p239_p2), %v809_v0  ;;  %727 = vmatpush3.bf16.msra.mxu1 (!%p239_p2), %v778_v7  ;;  %v676_v39 = vld [vmem:[%s960_s4] ss:$0 sm:$0xff] (!%p239_p2) }
   0xd   : > { %s965_s28 = smov (!%p271_p3, %s666_s28), 3  ;;  %728 = vmatprep.subr.bf16.mxu1 %v809_v0  ;;  %v687_v55 = vld [vmem:[%s962_s6] ss:$0 sm:$0xff] }
   0xe   : > { %s667_s10 = sshll.u32 %s965_s28, 2  ;;  %s669_s26 = sshll.u32 %s965_s28, 3 }
   0xf   : > { %s274_s13 = scalar_lea.vmem %s956_s0, %s667_s10  ;;  %s280_s9 = scalar_lea.vmem %s963_s7, %s669_s26 }
  0x10   : > { %v776_v8 = vld [vmem:[%s274_s13] sm:$0xff]   ;;  %729 = vmatpush3.bf16.msra.mxu1 %v779_v9 }
  0x11   : > { %721 = vmatmul.mubr.msk.bf16.vlgmr.msra.gmra.mrb[0].mxu0 %vm304_vm3, %v776_v8  ;;  %730 = vmatprep.subr.bf16.mxu1 %v809_v0 }
  0x12   : > { %760 = vmatprep.mubr.msk.bf16.mxu0 %vm811_vm2, %v809_v0  ;;  %745 = vmatpush3.bf16.msra.mxu0 %v785_v15 }
  0x13   : > { %746 = vmatprep.subr.bf16.mxu0 %v809_v0 }
  0x14   : > { %731 = vmatpush3.bf16.msra.mxu1 %v780_v10 }
  0x15   : > { %732 = vmatprep.subr.bf16.mxu1 %v809_v0 }
  0x16   : > { %747 = vmatpush3.bf16.msra.mxu0 %v786_v16 }
  0x17   : > { %748 = vmatprep.subr.bf16.mxu0 %v809_v0 }
  0x18   : > { %733 = vmatpush3.bf16.msra.mxu1 %v781_v11 }
  0x19   : > { %734 = vmatprep.subr.bf16.mxu1 %v809_v0 }
  0x1a   : > { %749 = vmatpush3.bf16.msra.mxu0 %v787_v33 }
  0x1b   : > { %750 = vmatprep.subr.bf16.mxu0 %v809_v0 }
  0x1c   : > { %735 = vmatpush3.bf16.msra.mxu1 %v782_v12 }
  0x1d   : > { %736 = vmatprep.subr.bf16.mxu1 %v809_v0 }
  0x1e   : > { %751 = vmatpush3.bf16.msra.mxu0 %v788_v34 }
  0x1f   : > { %752 = vmatprep.subr.bf16.mxu0 %v809_v0 }
  0x20   : > { %737 = vmatpush3.bf16.msra.mxu1 %v783_v13 }
  0x21   : > { %738 = vmatprep.subr.bf16.mxu1 %v809_v0 }
  0x22   : > { %753 = vmatpush3.bf16.msra.mxu0 %v789_v35 }
  0x23   : > { %754 = vmatprep.subr.bf16.mxu0 %v809_v0 }
  0x24   : > { %739 = vmatpush3.bf16.msra.mxu1 %v784_v14 }
  0x26   : > { %755 = vmatpush3.bf16.msra.mxu0 %v790_v36 }
  0x27   : > { %756 = vmatprep.subr.bf16.mxu0 %v809_v0 }
  0x2a   : > { %757 = vmatpush3.bf16.msra.mxu0 %v791_v37 }
  0x2b   : > { %758 = vmatprep.subr.bf16.mxu0 %v809_v0 }
  0x2e   : > { %759 = vmatpush3.bf16.msra.mxu0 %v792_v38 }
  0xe4   : > { %v349_v18 = vpop.f32.mrb[0].mxu0 }
  0xe5   : > { %v350_v19 = vadd.f32 %v670_v17, %v349_v18  ;;  %v722_v20 = vpop.f32.mrb[1].mxu0 }
  0xe6   : > { %v352_v21 = vpop.f32.mrb[2].mxu0 }
  0xe7   : > { %v358_v22 = vmul.f32 1.442695, %v350_v19  ;;  %v353_v23 = vadd.f32 %v670_v17, %v352_v21  ;;  %v723_v24 = vpop.f32.mrb[3].mxu0  ;;  %vm356_vm4 = vcmp.gt.f32.partialorder %v350_v19, 0.0 }
  0xe9   : > { %793 = vpow2.f32 %v358_v22  ;;  %v360_v25 = vmul.f32 1.442695, %v353_v23  ;;  %vm357_vm5 = vcmp.gt.f32.partialorder %v353_v23, 0.0 }
  0xeb   : > { %795 = vpow2.f32 %v360_v25 }
  0xf3   : > { %v794_v26 = vpop.eup %793 }
  0xf4   : > { %v674_v27 = vadd.f32 -1.0, %v794_v26 }
  0xf5   : > { %v796_v28 = vpop.eup %795 }
  0xf6   : > { %v675_v29 = vadd.f32 -1.0, %v796_v28  ;;  %v364_v30 = vsel %vm356_vm4, %v350_v19, %v674_v27 }
  0xf8   : > { %v365_v31 = vsel %vm357_vm5, %v353_v23, %v675_v29 }
  0xf9   : > { %v366_v32 = vpack.c.bf16 %v365_v31, %v364_v30 }
  0xfb   : > { %741 = vmatmul.mubr.bf16.vlgmr.msra.gmra.mrb[0].mxu1 %v366_v32 }
 0x1ce   : > { %v472_v40 = vpop.f32.mrb[0].mxu1 }
 0x1cf   : > { %v473_v41 = vadd.f32 %v676_v39, %v472_v40  ;;  %v742_v42 = vpop.f32.mrb[1].mxu1 }
 0x1d0   : > { %v475_v43 = vpop.f32.mrb[2].mxu1 }
 0x1d1   : > { %v481_v44 = vmul.f32 1.442695, %v473_v41  ;;  %v476_v45 = vadd.f32 %v676_v39, %v475_v43  ;;  %v743_v46 = vpop.f32.mrb[3].mxu1  ;;  %vm479_vm6 = vcmp.gt.f32.partialorder %v473_v41, 0.0 }
 0x1d3   : > { %797 = vpow2.f32 %v481_v44  ;;  %v483_v47 = vmul.f32 1.442695, %v476_v45  ;;  %vm480_vm7 = vcmp.gt.f32.partialorder %v476_v45, 0.0 }
 0x1d5   : > { %799 = vpow2.f32 %v483_v47 }
 0x1dd   : > { %v798_v48 = vpop.eup %797 }
 0x1de   : > { %v685_v49 = vadd.f32 -1.0, %v798_v48 }
 0x1df   : > { %v800_v50 = vpop.eup %799 }
 0x1e0   : > { %v686_v51 = vadd.f32 -1.0, %v800_v50  ;;  %v487_v52 = vsel %vm479_vm6, %v473_v41, %v685_v49 }
 0x1e2   : > { %v488_v53 = vsel %vm480_vm7, %v476_v45, %v686_v51 }
 0x1e3   : > { %v489_v54 = vpack.c.bf16 %v488_v53, %v487_v52 }
 0x1e5   : > { %761 = vmatmul.mubr.bf16.vlgmr.msra.gmra.mrb[4].mxu0 %v489_v54 }
 0x2b8   : > { %v595_v56 = vpop.f32.mrb[4].mxu0 }
 0x2b9   : > { %v596_v57 = vadd.f32 %v687_v55, %v595_v56  ;;  %v762_v58 = vpop.f32.mrb[5].mxu0 }
 0x2ba   : > { %v598_v59 = vpop.f32.mrb[6].mxu0 }
 0x2bb   : > { %603 = vst.msk [vmem:[%s280_s9] sm:$0xff] %vm602_vm8, %v596_v57  ;;  %v599_v60 = vadd.f32 %v687_v55, %v598_v59  ;;  %v763_v61 = vpop.f32.mrb[7].mxu0 }
 0x2bd   : > { %604 = vst.msk [vmem:[%s280_s9 + $0x8] sm:$0xff] %vm602_vm8, %v599_v60 }
 0x2be PF: > { %s17_s24 = sadd.s32 1, %s807_s24  }
 0x2bf   : > { %p14_p4 = scmp.ge.s32.totalorder %s17_s24, 4  }
 0x2c1   :  { %16 = sbr.rel (!%p14_p4) target bundleno = 1 (0x1), region = 78 }

</bundles_post_ra>
